<compile_context>
chip_gen: v5e
topology: v5e:2x2
jax: 0.10.0
libtpu: 0.0.40
codegen_flags: <defaults>
</compile_context>

<pallas_src>
import jax
import jax.numpy as jnp
from jax import lax
from jax.experimental import pallas as pl
from jax.experimental.pallas import tpu as pltpu

_TILE_R, _TILE_C = 8, 128  # one f32 vreg


def _rand_like_kernel(seed_ref, o_ref):
    """Fill o_ref with uniform [0, 1) floats derived from (seed, element index)."""
    seed = seed_ref[0].astype(jnp.uint32)

    # Per-element counter.
    rows = lax.broadcasted_iota(jnp.int32, o_ref.shape, 0)
    cols = lax.broadcasted_iota(jnp.int32, o_ref.shape, 1)
    idx = (rows * o_ref.shape[1] + cols).astype(jnp.uint32)

    # Mix seed into the counter, then murmur3 fmix32 finalizer (VPU-only ops:
    # xor / logical shift / wrapping 32-bit multiply).
    x = idx ^ (seed * jnp.uint32(0x9E3779B9))
    x = x ^ (x >> jnp.uint32(16))
    x = x * jnp.uint32(0x85EBCA6B)
    x = x ^ (x >> jnp.uint32(13))
    x = x * jnp.uint32(0xC2B2AE35)
    x = x ^ (x >> jnp.uint32(16))

    # Top 24 bits -> uniform f32 in [0, 1) (exact i32->f32 conversion).
    u24 = (x >> jnp.uint32(8)).astype(jnp.int32).astype(jnp.float32)
    o_ref[...] = u24 * jnp.float32(1.0 / (1 << 24))

    # NOTE: the module's dropout(x1, p=0.4) is intentionally not computed:
    # its result is discarded by the PyTorch forward, so it contributes
    # nothing to the output.


def model_forward(x1, seed=0):
    """Model.forward equivalent: returns uniform rand_like(x1).

    NOTE: callers must thread a fresh `seed` per invocation to get new
    random values (seed=0 always yields the same tensor).
    """
    orig_shape = x1.shape
    orig_dtype = x1.dtype
    n = x1.size

    # TODO(synk): for inputs larger than one vreg, grid over lane-dense
    # (block, 128)-shaped tiles of the flattened size instead of asserting.
    assert n <= _TILE_R * _TILE_C, "demo kernel handles a single (8,128) tile"

    seed_arr = jnp.array([seed], dtype=jnp.int32)

    tile = pl.pallas_call(
        _rand_like_kernel,
        out_shape=jax.ShapeDtypeStruct((_TILE_R, _TILE_C), jnp.float32),
        # Gridless: kernel runs once on whole-array refs.  Seed lives in SMEM.
        in_specs=[pl.BlockSpec(memory_space=pltpu.MemorySpace.SMEM)],
        out_specs=pl.BlockSpec(memory_space=pltpu.MemorySpace.VMEM),
    )(seed_arr)

    return tile.reshape(-1)[:n].reshape(orig_shape).astype(orig_dtype)


if __name__ == "__main__":
    key = jax.random.PRNGKey(0)
    x1 = jax.random.normal(key, (1, 2, 2), dtype=jnp.float32)

    y = model_forward(x1, seed=0)
    y = jax.block_until_ready(y)

    assert y.shape == x1.shape, (y.shape, x1.shape)
    assert y.dtype == x1.dtype, (y.dtype, x1.dtype)
    # rand_like produces uniform values in [0, 1)
    assert bool(jnp.all(y >= 0.0)) and bool(jnp.all(y < 1.0))
    # different seeds produce different noise
    y2 = jax.block_until_ready(model_forward(x1, seed=1))
    assert bool(jnp.any(y2 != y))

    print("KERNEL_OK")
</pallas_src>

<mosaic_0001>
module attributes {stable_mosaic.version = 11 : i64} {
  func.func @_rand_like_kernel(%arg0: memref<1xi32, #tpu.memory_space<smem>>, %arg1: memref<8x128xf32, #tpu.memory_space<vmem>>) attributes {dimension_semantics = [], scalar_prefetch = 0 : i64, scratch_operands = 0 : i64, tpu.core_type = #tpu.core_type<tc>} {
    %c0 = arith.constant 0 : index
    %0 = memref.load %arg0[%c0] : memref<1xi32, #tpu.memory_space<smem>>
    %1 = tpu.iota {dimensions = array<i32: 0>} : vector<8x128xi32>
    %2 = tpu.iota {dimensions = array<i32: 1>} : vector<8x128xi32>
    %c128_i32 = arith.constant 128 : i32
    %3 = vector.broadcast %c128_i32 : i32 to vector<8x128xi32>
    %4 = arith.muli %1, %3 : vector<8x128xi32>
    %5 = arith.addi %4, %2 : vector<8x128xi32>
    %c-1640531527_i32 = arith.constant -1640531527 : i32
    %6 = arith.muli %0, %c-1640531527_i32 : i32
    %7 = vector.broadcast %6 : i32 to vector<8x128xi32>
    %8 = arith.xori %5, %7 : vector<8x128xi32>
    %c16_i32 = arith.constant 16 : i32
    %9 = vector.broadcast %c16_i32 : i32 to vector<8x128xi32>
    %10 = arith.shrui %8, %9 : vector<8x128xi32>
    %11 = arith.xori %8, %10 : vector<8x128xi32>
    %c-2048144789_i32 = arith.constant -2048144789 : i32
    %12 = vector.broadcast %c-2048144789_i32 : i32 to vector<8x128xi32>
    %13 = arith.muli %11, %12 : vector<8x128xi32>
    %c13_i32 = arith.constant 13 : i32
    %14 = vector.broadcast %c13_i32 : i32 to vector<8x128xi32>
    %15 = arith.shrui %13, %14 : vector<8x128xi32>
    %16 = arith.xori %13, %15 : vector<8x128xi32>
    %c-1028477387_i32 = arith.constant -1028477387 : i32
    %17 = vector.broadcast %c-1028477387_i32 : i32 to vector<8x128xi32>
    %18 = arith.muli %16, %17 : vector<8x128xi32>
    %c16_i32_0 = arith.constant 16 : i32
    %19 = vector.broadcast %c16_i32_0 : i32 to vector<8x128xi32>
    %20 = arith.shrui %18, %19 : vector<8x128xi32>
    %21 = arith.xori %18, %20 : vector<8x128xi32>
    %c8_i32 = arith.constant 8 : i32
    %22 = vector.broadcast %c8_i32 : i32 to vector<8x128xi32>
    %23 = arith.shrui %21, %22 : vector<8x128xi32>
    %24 = arith.sitofp %23 : vector<8x128xi32> to vector<8x128xf32>
    %cst = arith.constant 5.96046448E-8 : f32
    %25 = vector.broadcast %cst : f32 to vector<8x128xf32>
    %26 = arith.mulf %24, %25 : vector<8x128xf32>
    %c0_1 = arith.constant 0 : index
    %c0_2 = arith.constant 0 : index
    %27 = vector.load %arg1[%c0_1, %c0_2] : memref<8x128xf32, #tpu.memory_space<vmem>>, vector<8x128xf32>
    tpu.vector_store %arg1[%c0_1, %c0_2], %26 {strides = array<i32>} : memref<8x128xf32, #tpu.memory_space<vmem>>, vector<8x128xf32>,
    return
  }
}

</mosaic_0001>

<bundles_post_ra>
// kernel: tpu_custom_call.1
= control target key start
LH: loop header
LB: loop body
LE: loop exit
PB: predicated region body
PF: predicated region fallthrough
CT: control target
= control target key end

     0   :  { %v11_v0 = vlaneseq  ;;  %s92_s0 = inlined_call_operand.<no memory space> [shape: s32[1], index: 0, kind: input, shape index: {}]   ;;  %s93_s1 = inlined_call_operand.hbm [shape: f32[8,128], index: 1, kind: output, shape index: {}]  }
   0x1   :  { %7 = vsyncpa [#allocation4], 0  ;;  %s17_s8 = smul.u32 2654435769, %s92_s0  ;;  %s75_s9 = smov [#allocation3]  }
   0x2   :  { %v12_v1 = vshrl.u32 %v11_v0, 7  ;;  %v14_v2 = vand.u32 127, %v11_v0  ;;  %s37_s10 = sshll.u32 %s75_s9, 4  ;;  %s39_s0 = sshll.u32 %s93_s1, 4  ;;  %s38_s10 = int_to_ptr.vmem [resolvable:$true] %s37_s10  ;;  %s40_s0 = int_to_ptr.hbm [resolvable:$true] %s39_s0 }
   0x3   :  { %v18_v4 = vstv %s17_s8 }
   0x4   :  { %v15_v3 = vmul.u32 128, %v12_v1 }
   0x6   :  { %v16_v5 = vadd.s32 %v15_v3, %v14_v2 }
   0x8   :  { %v19_v6 = vxor.u32 %v18_v4, %v16_v5 }
   0xa   :  { %v20_v7 = vshrl.u32 %v19_v6, 16 }
   0xc   :  { %v21_v8 = vxor.u32 %v20_v7, %v19_v6 }
   0xe   :  { %v22_v9 = vmul.u32 2246822507, %v21_v8 }
  0x10   :  { %v23_v10 = vshrl.u32 %v22_v9, 13 }
  0x12   :  { %v24_v11 = vxor.u32 %v23_v10, %v22_v9 }
  0x14   :  { %v25_v12 = vmul.u32 3266489909, %v24_v11 }
  0x16   :  { %v26_v13 = vshrl.u32 %v25_v12, 16 }
  0x18   :  { %v27_v14 = vxor.u32 %v26_v13, %v25_v12 }
  0x1a   :  { %v28_v15 = vshrl.u32 %v27_v14, 8 }
  0x1c   :  { %v29_v16 = vcvt.s32.f32 %v28_v15 }
  0x1e   :  { %v30_v17 = vmul.f32 5.9604645e-08, %v29_v16 }
  0x20   :  { %31 = vst [vmem:[#allocation3] sm:$0xff] %v30_v17 }
  0x21   :  { %42 = dma.vmem_to_hbm [thread:$0]  %s38_s10, 128, %s40_s0, [#allocation4]  }
  0x22   :  { %73 = dma.done.wait [#allocation4], 128  }
  0x23   :  { %74 = vsyncadd [#allocation4], 4294967168 }
  0x24   :  { %47 = vsyncpa [#allocation4], 1 }

</bundles_post_ra>
